<compile_context>
chip_gen: v5e
topology: v5e:2x2
jax: 0.10.0
libtpu: 0.0.40
codegen_flags: <defaults>
</compile_context>

<pallas_src>
import math

import jax
import jax.numpy as jnp
from jax.experimental import pallas as pl
from jax.experimental.pallas import tpu as pltpu


def _round_up(x, m):
    return ((x + m - 1) // m) * m


def _cdiv(a, b):
    return (a + b - 1) // b


def _make_kernel(n_rows, tile_n, needs_mask):
    def kernel(x_ref, w_ref, c_ref, out_ref):
        x = x_ref[...]          # (tile_n, p)   f32 samples
        w = w_ref[...]          # (2p, Kp)      [[mu/var], [-0.5/var]] (zero-padded cols)
        c = c_ref[...]          # (1, Kp)       const + log_pi (pad cols = -1e30)

        # Fused quadratic + linear term: one MXU pass over contraction depth 2p.
        #   inner[n, k] = x_n @ (mu_k/var_k) + (x_n*x_n) @ (-0.5/var_k) + c_k
        x_aug = jnp.concatenate([x, x * x], axis=-1)             # (tile_n, 2p)
        inner = jnp.dot(x_aug, w, preferred_element_type=jnp.float32) + c

        # logsumexp over mixture components (lane axis); padded lanes hold
        # -1e30 so exp underflows to exactly 0.
        m = jnp.max(inner, axis=-1, keepdims=True)
        lse = m + jnp.log(jnp.sum(jnp.exp(inner - m), axis=-1, keepdims=True))

        if needs_mask:
            # Ragged last block: rows >= n_rows contain garbage (never read
            # from valid X); zero them before the tile reduction.
            i = pl.program_id(0)
            row = i * tile_n + jax.lax.broadcasted_iota(
                jnp.int32, (tile_n, 1), 0
            )
            lse = jnp.where(row < n_rows, lse, 0.0)

        partial = jnp.sum(lse)                                   # per-tile scalar
        out_ref[...] = jnp.zeros_like(out_ref) + partial

    return kernel


def mixture_log_likelihood(X, pi, mu, log_var, *, tile_n=4096):
    """Pallas forward pass of TorchMixtureModel with diag-Gaussian components.

    X:       (N, p) samples
    pi:      (K,)   unnormalized mixture weights (pre-softplus, as in module)
    mu:      (K, p) component means
    log_var: (K, p) component log-variances
    returns scalar float32 log-likelihood (sum over samples).
    """
    N, p = X.shape
    K = pi.shape[0]

    # ---- cheap parameter preprocessing (plain JAX) ------------------------
    log_pi = jax.nn.log_softmax(jax.nn.softplus(pi))              # (K,)
    inv_var = jnp.exp(-log_var)                                   # (K, p)
    const = -0.5 * (
        jnp.sum(mu * mu * inv_var, axis=1)
        + jnp.sum(log_var, axis=1)
        + p * math.log(2.0 * math.pi)
    )                                                             # (K,)

    # Pad component axis to a lane-dense width; padded log-weights = -1e30
    # so they contribute exp(...) == 0 to the logsumexp.
    Kp = _round_up(max(K, 1), 128)
    # Fused weight matrix: rows [0, p) multiply x, rows [p, 2p) multiply x*x.
    W = jnp.zeros((2 * p, Kp), jnp.float32)
    W = W.at[:p, :K].set((mu * inv_var).T.astype(jnp.float32))
    W = W.at[p:, :K].set((-0.5 * inv_var).T.astype(jnp.float32))
    C = jnp.full((1, Kp), -1e30, jnp.float32).at[0, :K].set(
        (const + log_pi).astype(jnp.float32))

    # ---- row tiling: big tiles, ragged edge handled in-kernel -------------
    tile_n = max(8, _round_up(int(tile_n), 8))
    if N > 8:
        # Keep >= 2 grid steps when possible so v7x's two TCs can split the
        # "parallel" axis; for large N the requested tile size wins.
        tile_n = min(tile_n, max(8, _round_up(_cdiv(N, 2), 8)))
    tile_n = min(tile_n, _round_up(N, 8))
    num_tiles = _cdiv(N, tile_n)
    needs_mask = (N % tile_n) != 0

    kernel = _make_kernel(N, tile_n, needs_mask)

    Xf = X.astype(jnp.float32)

    partials = pl.pallas_call(
        kernel,
        out_shape=jax.ShapeDtypeStruct((num_tiles, 8, 128), jnp.float32),
        grid_spec=pltpu.PrefetchScalarGridSpec(
            num_scalar_prefetch=0,
            grid=(num_tiles,),
            in_specs=[
                pl.BlockSpec((tile_n, p), lambda i: (i, 0)),     # X tile (streamed)
                pl.BlockSpec((2 * p, Kp), lambda i: (0, 0)),     # W (resident)
                pl.BlockSpec((1, Kp), lambda i: (0, 0)),         # C (resident)
            ],
            out_specs=pl.BlockSpec((1, 8, 128), lambda i: (i, 0, 0)),
        ),
        compiler_params=pltpu.CompilerParams(
            dimension_semantics=("parallel",),   # no cross-step deps -> megacore OK
            # Covers double-buffered X + fused x_aug + (tile_n, Kp) temporaries
            # at tile_n<=8192; above v5e/v6e/v7x scoped defaults, below v7x's
            # 64 MiB physical VMEM.
            vmem_limit_bytes=48 * 1024 * 1024,
        ),
    )(Xf, W, C)

    # final reduction of per-tile partial sums (tiny) in plain JAX
    return jnp.sum(partials[:, 0, 0])


def mixture_log_likelihood_ref(X, pi, mu, log_var):
    """Pure-JAX reference matching the PyTorch forward exactly."""
    p = X.shape[1]
    log_pi = jax.nn.log_softmax(jax.nn.softplus(pi))[:, None]          # (K, 1)
    diff = X[None, :, :] - mu[:, None, :]                              # (K, N, p)
    log_pdf = -0.5 * (
        jnp.sum(diff * diff * jnp.exp(-log_var)[:, None, :], axis=-1)
        + jnp.sum(log_var, axis=-1, keepdims=True)
        + p * math.log(2.0 * math.pi)
    )                                                                  # (K, N)
    inner = log_pi + log_pdf
    ll_i = jax.scipy.special.logsumexp(inner, axis=0)
    return jnp.sum(ll_i)


if __name__ == "__main__":
    key = jax.random.PRNGKey(0)
    k_pi, k_mu, k_lv, k_x, k_x2 = jax.random.split(key, 5)

    K = 4        # number of mixture components
    p = 90       # dist_dim (module default)
    N = 64       # number of samples

    # deterministic parameter init (shapes from TorchMixtureModel.__init__)
    pi = jax.random.uniform(k_pi, (K,), dtype=jnp.float32)              # torch.rand(K)
    mu = jax.random.normal(k_mu, (K, p), dtype=jnp.float32)
    log_var = 0.1 * jax.random.normal(k_lv, (K, p), dtype=jnp.float32)

    X = jax.random.normal(k_x, (N, p), dtype=jnp.float32)

    out = mixture_log_likelihood(X, pi, mu, log_var)
    out = jax.block_until_ready(out)
    ref = mixture_log_likelihood_ref(X, pi, mu, log_var)
    assert jnp.allclose(out, ref, rtol=1e-4, atol=1e-3), (out, ref)

    # second check: ragged N (exercises the un-padded edge block + row mask)
    N2 = 200
    X2 = jax.random.normal(k_x2, (N2, p), dtype=jnp.float32)
    out2 = mixture_log_likelihood(X2, pi, mu, log_var, tile_n=128)
    out2 = jax.block_until_ready(out2)
    ref2 = mixture_log_likelihood_ref(X2, pi, mu, log_var)
    assert jnp.allclose(out2, ref2, rtol=1e-4, atol=1e-3), (out2, ref2)

    print("KERNEL_OK")
</pallas_src>

<mosaic_0001>
module attributes {stable_mosaic.version = 11 : i64} {
  func.func @kernel(%arg0: i32, %arg1: memref<32x90xf32, #tpu.memory_space<vmem>>, %arg2: memref<180x128xf32, #tpu.memory_space<vmem>>, %arg3: memref<1x128xf32, #tpu.memory_space<vmem>>, %arg4: memref<1x8x128xf32, #tpu.memory_space<vmem>>) attributes {dimension_semantics = [#tpu.dimension_semantics<parallel>], iteration_bounds = array<i64: 2>, scalar_prefetch = 0 : i64, scratch_operands = 0 : i64, tpu.core_type = #tpu.core_type<tc>, window_params = [{transform_indices = @transform_0, window_bounds = array<i64: 32, 90>}, {pipeline_mode = #tpu.pipeline_mode<synchronous>, transform_indices = @transform_1, window_bounds = array<i64: 180, 128>}, {pipeline_mode = #tpu.pipeline_mode<synchronous>, transform_indices = @transform_2, window_bounds = array<i64: 1, 128>}, {transform_indices = @transform_3, window_bounds = array<i64: 1, 8, 128>}]} {
    %c0 = arith.constant 0 : index
    %c0_0 = arith.constant 0 : index
    %0 = vector.load %arg1[%c0, %c0_0] : memref<32x90xf32, #tpu.memory_space<vmem>>, vector<32x90xf32>
    %c0_1 = arith.constant 0 : index
    %c0_2 = arith.constant 0 : index
    %1 = vector.load %arg2[%c0_1, %c0_2] : memref<180x128xf32, #tpu.memory_space<vmem>>, vector<180x128xf32>
    %c0_3 = arith.constant 0 : index
    %c0_4 = arith.constant 0 : index
    %2 = vector.load %arg3[%c0_3, %c0_4] : memref<1x128xf32, #tpu.memory_space<vmem>>, vector<1x128xf32>
    %3 = arith.mulf %0, %0 : vector<32x90xf32>
    %4 = tpu.concatenate %0, %3 in 1 : vector<32x90xf32>, vector<32x90xf32> -> vector<32x180xf32>
    %cst = arith.constant dense<0.000000e+00> : vector<32x128xf32>
    %5 = tpu.matmul %4, %1, %cst {dimension_numbers = #tpu.dot_dimension_numbers<[1], [0], [0], [1], [0, 0, 1, 1], [], []>} : vector<32x180xf32>, vector<180x128xf32>, vector<32x128xf32> -> vector<32x128xf32>
    %6 = vector.broadcast %2 : vector<1x128xf32> to vector<32x128xf32>
    %7 = arith.addf %5, %6 : vector<32x128xf32>
    %cst_5 = arith.constant dense<0xFF800000> : vector<32xf32>
    %8 = vector.multi_reduction <maximumf>, %7, %cst_5 [1] : vector<32x128xf32> to vector<32xf32>
    %9 = vector.shape_cast %8 : vector<32xf32> to vector<32x1xf32>
    %10 = vector.broadcast %9 : vector<32x1xf32> to vector<32x128xf32>
    %11 = arith.subf %7, %10 : vector<32x128xf32>
    %12 = math.exp %11 : vector<32x128xf32>
    %cst_6 = arith.constant dense<0.000000e+00> : vector<32xf32>
    %13 = vector.multi_reduction <add>, %12, %cst_6 [1] : vector<32x128xf32> to vector<32xf32>
    %14 = vector.shape_cast %13 : vector<32xf32> to vector<32x1xf32>
    %15 = math.log %14 : vector<32x1xf32>
    %16 = arith.addf %9, %15 : vector<32x1xf32>
    %17 = vector.shape_cast %16 : vector<32x1xf32> to vector<1x32x1xf32>
    %cst_7 = arith.constant dense<0.000000e+00> : vector<1xf32>
    %18 = vector.multi_reduction <add>, %17, %cst_7 [1, 2] : vector<1x32x1xf32> to vector<1xf32>
    %19 = vector.shape_cast %18 : vector<1xf32> to vector<1x1x1xf32>
    %20 = vector.extract %19[0, 0, 0] : f32 from vector<1x1x1xf32>
    %cst_8 = arith.constant 0.000000e+00 : f32
    %21 = vector.broadcast %cst_8 : f32 to vector<1x8x128xf32>
    %22 = vector.broadcast %20 : f32 to vector<1x8x128xf32>
    %23 = arith.addf %21, %22 : vector<1x8x128xf32>
    %c0_9 = arith.constant 0 : index
    %c0_10 = arith.constant 0 : index
    %c0_11 = arith.constant 0 : index
    %24 = vector.load %arg4[%c0_9, %c0_10, %c0_11] : memref<1x8x128xf32, #tpu.memory_space<vmem>>, vector<1x8x128xf32>
    tpu.vector_store %arg4[%c0_9, %c0_10, %c0_11], %23 {strides = array<i32>} : memref<1x8x128xf32, #tpu.memory_space<vmem>>, vector<1x8x128xf32>,
    return
  }
  func.func @transform_0(%arg0: i32) -> (i32, i32) {
    %c0_i32 = arith.constant 0 : i32
    %c0_i32_0 = arith.constant 0 : i32
    return %arg0, %c0_i32 : i32, i32
  }
  func.func @transform_1(%arg0: i32) -> (i32, i32) {
    %c0_i32 = arith.constant 0 : i32
    %c0_i32_0 = arith.constant 0 : i32
    %c0_i32_1 = arith.constant 0 : i32
    return %c0_i32, %c0_i32_0 : i32, i32
  }
  func.func @transform_2(%arg0: i32) -> (i32, i32) {
    %c0_i32 = arith.constant 0 : i32
    %c0_i32_0 = arith.constant 0 : i32
    %c0_i32_1 = arith.constant 0 : i32
    return %c0_i32, %c0_i32_0 : i32, i32
  }
  func.func @transform_3(%arg0: i32) -> (i32, i32, i32) {
    %c0_i32 = arith.constant 0 : i32
    %c0_i32_0 = arith.constant 0 : i32
    %c0_i32_1 = arith.constant 0 : i32
    return %arg0, %c0_i32, %c0_i32_0 : i32, i32, i32
  }
}

</mosaic_0001>

<bundles_post_ra>
// kernel: tpu_custom_call.1
= control target key start
LH: loop header
LB: loop body
LE: loop exit
PB: predicated region body
PF: predicated region fallthrough
CT: control target
= control target key end

     0   :  { %8 = vsyncpa [#allocation3], 0  ;;  %s952_s0 = inlined_call_operand.hbm [shape: f32[64,90], index: 0, kind: input, shape index: {}]   ;;  %s953_s1 = inlined_call_operand.hbm [shape: f32[180,128], index: 1, kind: input, shape index: {}]   ;;  %s954_s2 = inlined_call_operand.vmem [shape: f32[1,128], index: 2, kind: input, shape index: {}]   ;;  %s955_s3 = inlined_call_operand.hbm [shape: f32[2,8,128], index: 3, kind: output, shape index: {}]  }
   0x1   :  { %10 = vsyncpa [#allocation3 + $0x1], 0 }
   0x2   :  { %11 = vsyncpa [#allocation6], 0 }
   0x3   :  { %12 = vsyncpa [#allocation4], 0 }
   0x4   :  { %14 = vsyncpa [#allocation4 + $0x1], 0  ;;  %s780_s12 = smov 0   ;;  %s782_s13 = smov 0  }
   0x5   :  { %s784_s14 = smov 0   ;;  %s786_s15 = smov 0  }
   0x6 LB: > { %s801_s16 = sadd.s32 4294967295, %s754_s15   ;;  %s492_s17 = sadd.s32 4294967294, %s754_s15   ;;  %s754_s15 = sphi %s786_s15, %s965_s15   ;;  %s750_s14 = sphi %s784_s14, %s964_s14   ;;  %s746_s13 = sphi %s782_s13, %s963_s13   ;;  %s742_s12 = sphi %s780_s12, %s962_s12  }
   0x7   : > { %p40_p0 = scmp.ne.s32.totalorder %s746_s13, %s742_s12  ;;  %p41_p1 = scmp.eq.s32.totalorder %s801_s16, 0 }
   0x8   : > { %p106_p2 = scmp.eq.s32.totalorder %s801_s16, 1  ;;  %p112_p3 = scmp.eq.s32.totalorder %s492_s17, 1 }
   0x9   : > { %p810_p4 = por %p41_p1, %p40_p0  ;;  %p493_p5 = scmp.ge.s32.totalorder %s754_s15, 1 }
   0xa   : > { %p815_p6 = por %p112_p3, %p40_p0  ;;  %p119_p7 = scmp.lt.s32.totalorder %s754_s15, 3 }
   0xb   : > { %s130_s22 = sshll.u32 %s953_s1, 4  ;;  %s756_s24 = smov [#allocation5]   ;;  %s131_s22 = int_to_ptr.hbm [resolvable:$true] %s130_s22 }
   0xc   : > { %p823_p8 = pnand %p493_p5, %p119_p7  ;;  %s132_s25 = sshll.u32 %s756_s24, 4  ;;  %s133_s25 = int_to_ptr.vmem [resolvable:$true] %s132_s25 }
   0xd   : > { %s833_s26 = sadd.s32 1, %s754_s15   ;;  %s757_s27 = smov 128  }
   0xe   : > { %p555_p9 = pneg %p823_p8  ;;  %s758_s28 = smov 8  }
   0xf   : > { %s24_s29 = ssub.s32 %s754_s15, %s833_s26  ;;  %s27_s30 = sadd.s32 1, %s750_s14 }
  0x10   : > { %p556_p10 = pnand %p555_p9, %p41_p1  ;;  %p25_p12 = scmp.eq.s32.totalorder %s24_s29, 0 }
  0x11   : > { %p34_p13 = scmp.ne.s32.totalorder %s750_s14, %s746_s13  ;;  %p35_p0 = scmp.eq.s32.totalorder %s754_s15, 0 }
  0x12   : > { %558 = dma.hbm_to_vmem [thread:$0]  (!%p556_p10), %s131_s22, 2944, %s133_s25, [#allocation6], %s757_s27, %s757_s27, %s758_s28  }
  0x13   : > { %s845_s4 = scalar_select %p25_p12, %s750_s14, %s27_s30  }
  0x14   : > { %p849_p3 = por %p106_p2, %p34_p13  ;;  %p568_p5 = scmp.lt.s32.totalorder %s754_s15, 2 }
  0x15   : > { %s149_s6 = sand.u32 1, %s750_s14   ;;  %s512_s7 = sshll.u32 %s754_s15, 5 }
  0x16   : > { %p36_p7 = por %p35_p0, %p34_p13  ;;  %s496_s8 = sshll.u32 %s149_s6, 5 }
  0x17   : > { %s158_s11 = scalar_lea.hbm %s952_s0, %s512_s7  ;;  %s153_s20 = scalar_lea.vmem [#allocation2], %s496_s8 }
  0x18   : > { %s159_s17 = sshll.u32 %s158_s11, 4  ;;  %s161_s21 = sshll.u32 %s153_s20, 4  ;;  %s160_s17 = int_to_ptr.hbm [resolvable:$true] %s159_s17  ;;  %s162_s21 = int_to_ptr.vmem [resolvable:$true] %s161_s21 }
  0x19   : > { %p859_p9 = pnand %p568_p5, %p36_p7  ;;  %s150_s24 = scalar_lea.sflag [#allocation3], %s149_s6 }
  0x1a   : > { %s654_s25 = sshra.s32 %s160_s17, 4  ;;  %s661_s8 = scalar_lea.hbm %s952_s0, 64  ;;  %s655_s25 = int_to_ptr.hbm [resolvable:$true] %s654_s25 }
  0x1b   : > { %s656_s29 = scalar_lea.hbm %s655_s25, 32  ;;  %p658_p10 = pneg %p859_p9 }
  0x1c   : > { %p657_p2 = scmp.ne.s32.totalorder %s655_s25, %s656_s29  ;;  %p662_p0 = scmp.lt.s32.totalorder %s655_s25, %s952_s0 }
  0x1d   : > { %p663_p5 = scmp.lt.s32.totalorder %s661_s8, %s656_s29 }
  0x1e   : > { %p659_p12 = pnand %p658_p10, %p657_p2 }
  0x1f   : > { %p664_p7 = por %p663_p5, %p662_p0 }
  0x20   : > { %p660_p13 = pneg %p659_p12 }
  0x22   : > { %p665_p11 = pnand %p664_p7, %p660_p13 }
  0x24   : > { %668 = shalt.err (!%p665_p11)
}
  0x25   : > { %562 = dma.hbm_to_vmem [thread:$0]  (!%p859_p9), %s160_s17, 512, %s162_s21, %s150_s24, %s757_s27, %s757_s27, %s758_s28  }
  0x26   : > { %173 = sbr.rel (%p823_p8) target bundleno = 758 (0x2f6), region = 32  ;;  %s879_s6 = sand.u32 (!%p823_p8), 1, %s746_s13  }
  0x27   : > { %s500_s11 = sshll.u32 (!%p823_p8), %s879_s6, 5  ;;  %s176_s20 = scalar_lea.sflag (!%p823_p8), [#allocation3], %s879_s6 }
  0x28   : > { %s179_s25 = scalar_lea.vmem (!%p823_p8), [#allocation2], %s500_s11 }
  0x2b   : > { %729 = dma.done.wait (%p810_p4), %s176_s20, 512  }
  0x2c   : > { %731 = vsyncadd (%p810_p4), %s176_s20, 4294966784 }
  0x2d   : > { %733 = dma.done.wait (%p41_p1), [#allocation6], 2944  }
  0x2e   : > { %735 = vsyncadd (%p41_p1), [#allocation6], 4294964352  ;;  %v891_v0 = vld [vmem:[%s179_s25 + $0x8] sm:$0xff]  ;;  %v893_v1 = vld [vmem:[%s179_s25] sm:$0xff]  ;;  %vm274_vm0 = vcmask 1043456   ;;  %s759_s18 = smov 90  }
  0x2f   : > { %v238_v2 = vmul.f32 %v891_v0, %v891_v0  ;;  %v237_v3 = vmul.f32 %v893_v1, %v893_v1  ;;  %v228_v4 = vld [vmem:[#allocation5 + $0x78] sm:$0xff]  ;;  %v227_v5 = vld [vmem:[#allocation5 + $0x70] sm:$0xff]  ;;  %v226_v6 = vld [vmem:[#allocation5 + $0x68] sm:$0xff]  ;;  %vm265_vm1 = vcmask 424960   ;;  %vm257_vm2 = vcmask 736256   ;;  %s502_s28 = sshll.u32 %s879_s6, 3 }
  0x30   : > { %278 = vmatpush.msra.mxu0 %v228_v4  ;;  %513 = vmatpush.msra.mxu2 %v228_v4  ;;  %v899_v7 = vld [vmem:[%s179_s25 + $0x10] sm:$0xff]  ;;  %v901_v8 = vld [vmem:[%s179_s25 + $0x18] sm:$0xff]  ;;  %v225_v10 = vld [vmem:[#allocation5 + $0x60] sm:$0xff]  ;;  %vm376_vm3 = vcmask 7168   ;;  %s509_s17 = sshll.u32 %s801_s16, 3  ;;  %s207_s29 = scalar_lea.vmem [#allocation7], %s502_s28 }
  0x31   : > { %247 = vrot.lane.b32.xlu1 %v238_v2, %s759_s18  ;;  %245 = vrot.lane.b32.xlu0 %v237_v3, %s759_s18  ;;  %v235_v9 = vld [vmem:[#allocation5 + $0xb0] sm:$0xf]  ;;  %v234_v11 = vld [vmem:[#allocation5 + $0xa8] sm:$0xff]  ;;  %v233_v12 = vld [vmem:[#allocation5 + $0xa0] sm:$0xff]  ;;  %v239_v13 = vmul.f32 %v899_v7, %v899_v7  ;;  %v240_v14 = vmul.f32 %v901_v8, %v901_v8  ;;  %s407_s24 = scalar_lea.hbm %s955_s3, %s509_s17  ;;  %s409_s30 = sshll.u32 %s207_s29, 4  ;;  %s410_s30 = int_to_ptr.vmem [resolvable:$true] %s409_s30 }
  0x32   : > { %279 = vmatpush.msra.mxu0 %v227_v5  ;;  %515 = vmatpush.msra.mxu2 %v227_v5  ;;  %v224_v15 = vld [vmem:[#allocation5 + $0x58] sm:$0xff]  ;;  %v223_v16 = vld [vmem:[#allocation5 + $0x50] sm:$0xff]  ;;  %v222_v18 = vld [vmem:[#allocation5 + $0x48] sm:$0xff]  ;;  %s411_s7 = sshll.u32 %s407_s24, 4  ;;  %s397_s9 = scalar_lea.sflag [#allocation4], %s879_s6  ;;  %s412_s7 = int_to_ptr.hbm [resolvable:$true] %s411_s7 }
  0x33   : > { %514 = vmatpush.msra.mxu3 %v228_v4  ;;  %503 = vmatpush.msk.msra.mxu1 %vm274_vm0, %v235_v9  ;;  %v232_v17 = vld [vmem:[#allocation5 + $0x98] sm:$0xff]  ;;  %v231_v19 = vld [vmem:[#allocation5 + $0x90] sm:$0xff]  ;;  %v221_v20 = vld [vmem:[#allocation5 + $0x40] sm:$0xff]  ;;  %s698_s10 = sshra.s32 %s412_s7, 4  ;;  %s704_s25 = scalar_lea.hbm %s955_s3, 16  ;;  %s699_s10 = int_to_ptr.hbm [resolvable:$true] %s698_s10 }
  0x34   : > { %280 = vmatpush.msra.mxu0 %v226_v6  ;;  %517 = vmatpush.msra.mxu2 %v226_v6  ;;  %v230_v21 = vld [vmem:[#allocation5 + $0x88] sm:$0xff]  ;;  %v220_v22 = vld [vmem:[#allocation5 + $0x38] sm:$0xff]  ;;  %v229_v23 = vld [vmem:[#allocation5 + $0x80] sm:$0xff]  ;;  %s700_s11 = scalar_lea.hbm %s699_s10, 8  ;;  %p705_p11 = scmp.lt.s32.totalorder %s699_s10, %s955_s3 }
  0x35   : > { %516 = vmatpush.msra.mxu3 %v227_v5  ;;  %317 = vmatpush.msra.mxu1 %v234_v11  ;;  %v219_v24 = vld [vmem:[#allocation5 + $0x30] sm:$0xff]  ;;  %v218_v25 = vld [vmem:[#allocation5 + $0x28] sm:$0xff]  ;;  %v217_v26 = vld [vmem:[#allocation5 + $0x20] sm:$0xff]  ;;  %p701_p1 = scmp.ne.s32.totalorder %s699_s10, %s700_s11  ;;  %p706_p9 = scmp.lt.s32.totalorder %s704_s25, %s700_s11 }
  0x36   : > { %281 = vmatpush.msra.mxu0 %v225_v10  ;;  %519 = vmatpush.msra.mxu2 %v225_v10  ;;  %v216_v27 = vld [vmem:[#allocation5 + $0x18] sm:$0xff]  ;;  %v215_v28 = vld [vmem:[#allocation5 + $0x10] sm:$0xff]  ;;  %v214_v29 = vld [vmem:[#allocation5 + $0x8] sm:$0xff] }
  0x37   : > { %518 = vmatpush.msra.mxu3 %v226_v6  ;;  %318 = vmatpush.msra.mxu1 %v233_v12  ;;  %v213_v30 = vld [vmem:[#allocation5] sm:$0xff]  ;;  %p702_p4 = pnand %p701_p1, %p849_p3  ;;  %p707_p2 = por %p706_p9, %p705_p11 }
  0x38   : > { %282 = vmatpush.msra.mxu0 %v224_v15  ;;  %521 = vmatpush.msra.mxu2 %v224_v15  ;;  %v607_v39 = vld [vmem:[%s954_s2] ss:$0 sm:$0xff] }
  0x39   : > { %249 = vrot.lane.b32.xlu0 %v239_v13, %s759_s18  ;;  %251 = vrot.lane.b32.xlu1 %v240_v14, %s759_s18  ;;  %p703_p8 = pneg %p702_p4 }
  0x3a   : > { %283 = vmatpush.msra.mxu0 %v223_v16  ;;  %523 = vmatpush.msra.mxu2 %v223_v16 }
  0x3b   : > { %520 = vmatpush.msra.mxu3 %v225_v10  ;;  %319 = vmatpush.msra.mxu1 %v232_v17  ;;  %p708_p10 = pnand %p707_p2, %p703_p8 }
  0x3c   : > { %284 = vmatpush.msra.mxu0 %v222_v18  ;;  %525 = vmatpush.msra.mxu2 %v222_v18 }
  0x3d   : > { %522 = vmatpush.msra.mxu3 %v224_v15  ;;  %320 = vmatpush.msra.mxu1 %v231_v19 }
  0x3e   : > { %285 = vmatpush.msra.mxu0 %v221_v20  ;;  %527 = vmatpush.msra.mxu2 %v221_v20 }
  0x3f   : > { %524 = vmatpush.msra.mxu3 %v223_v16  ;;  %321 = vmatpush.msra.mxu1 %v230_v21 }
  0x40   : > { %286 = vmatpush.msra.mxu0 %v220_v22  ;;  %529 = vmatpush.msra.mxu2 %v220_v22 }
  0x41   : > { %526 = vmatpush.msra.mxu3 %v222_v18  ;;  %322 = vmatpush.msra.mxu1 %v229_v23 }
  0x42   : > { %287 = vmatpush.msra.mxu0 %v219_v24  ;;  %531 = vmatpush.msra.mxu2 %v219_v24 }
  0x43   : > { %528 = vmatpush.msra.mxu3 %v221_v20 }
  0x44   : > { %288 = vmatpush.msra.mxu0 %v218_v25  ;;  %533 = vmatpush.msra.mxu2 %v218_v25 }
  0x45   : > { %530 = vmatpush.msra.mxu3 %v220_v22 }
  0x46   : > { %289 = vmatpush.msra.mxu0 %v217_v26  ;;  %535 = vmatpush.msra.mxu2 %v217_v26 }
  0x47   : > { %532 = vmatpush.msra.mxu3 %v219_v24 }
  0x48   : > { %290 = vmatpush.msra.mxu0 %v216_v27  ;;  %537 = vmatpush.msra.mxu2 %v216_v27 }
  0x49   : > { %534 = vmatpush.msra.mxu3 %v218_v25 }
  0x4a   : > { %291 = vmatpush.msra.mxu0 %v215_v28  ;;  %539 = vmatpush.msra.mxu2 %v215_v28 }
  0x4b   : > { %536 = vmatpush.msra.mxu3 %v217_v26 }
  0x4c   : > { %292 = vmatpush.msra.mxu0 %v214_v29  ;;  %541 = vmatpush.msra.mxu2 %v214_v29 }
  0x4d   : > { %538 = vmatpush.msra.mxu3 %v216_v27 }
  0x4e   : > { %293 = vmatpush.msra.mxu0 %v213_v30  ;;  %543 = vmatpush.msra.mxu2 %v213_v30 }
  0x4f   : > { %540 = vmatpush.msra.mxu3 %v215_v28 }
  0x51   : > { %542 = vmatpush.msra.mxu3 %v214_v29 }
  0x53   : > { %544 = vmatpush.msra.mxu3 %v213_v30 }
  0xa3   : > { %v248_v31 = vpop.permute.xlu1 %247  ;;  %v246_v32 = vpop.permute.xlu0 %245 }
  0xa4   : > { %504 = vmatmul.msk.f32.vlgmr.msra.gmra.mxu1 %vm265_vm1, %v246_v32  ;;  %v258_v33 = vsel %vm257_vm2, %v893_v1, %v246_v32  ;;  %v259_v34 = vsel %vm257_vm2, %v891_v0, %v248_v31 }
  0xa5   : > { %294 = vmatmul.f32.vlgmr.msra.gmra.mxu0 %v258_v33  ;;  %297 = vmatmul.f32.vlgmr.msra.gmra.mxu2 %v259_v34 }
  0xab   : > { %v250_v35 = vpop.permute.xlu0 %249  ;;  %v252_v37 = vpop.permute.xlu1 %251 }
  0xac   : > { %505 = vmatmul.msk.f32.gmra.mxu1 %vm265_vm1, %v248_v31  ;;  %v260_v36 = vsel %vm257_vm2, %v899_v7, %v250_v35  ;;  %v261_v38 = vsel %vm257_vm2, %v901_v8, %v252_v37 }
  0xad   : > { %300 = vmatmul.f32.vlgmr.msra.gmra.mxu3 %v260_v36 }
  0xb4   : > { %506 = vmatmul.msk.f32.gmra.mxu1 %vm265_vm1, %v250_v35 }
  0xb5   : > { %303 = vmatmul.f32.gmra.mxu3 %v261_v38 }
  0xbc   : > { %507 = vmatmul.msk.f32.gmra.mxu1 %vm265_vm1, %v252_v37 }
 0x121   : > { %v324_v40 = vpop.f32.mrf.mxu1 }
 0x122   : > { %v295_v41 = vpop.f32.mrf.mxu0 }
 0x123   : > { %v296_v42 = vadd.f32 %v607_v39, %v295_v41 }
 0x125   : > { %v325_v43 = vadd.f32 %v324_v40, %v296_v42 }
 0x127   : > { %336 = vmax.xlane.f32.xlu2 %v325_v43 }
 0x128   : > { %v298_v44 = vpop.f32.mrf.mxu2 }
 0x129   : > { %v299_v45 = vadd.f32 %v607_v39, %v298_v44  ;;  %v327_v46 = vpop.f32.mrf.mxu1 }
 0x12b   : > { %v328_v47 = vadd.f32 %v327_v46, %v299_v45 }
 0x12f   : > { %338 = vmax.xlane.f32.xlu2 %v328_v47 }
 0x130   : > { %v301_v48 = vpop.f32.mrf.mxu3 }
 0x131   : > { %v302_v49 = vadd.f32 %v607_v39, %v301_v48  ;;  %v330_v50 = vpop.f32.mrf.mxu1 }
 0x133   : > { %v331_v51 = vadd.f32 %v330_v50, %v302_v49 }
 0x135   : > { %340 = vmax.xlane.f32.xlu0 %v331_v51 }
 0x138   : > { %v304_v52 = vpop.f32.mrf.mxu3 }
 0x139   : > { %v305_v53 = vadd.f32 %v607_v39, %v304_v52  ;;  %v333_v54 = vpop.f32.mrf.mxu1 }
 0x13b   : > { %v334_v55 = vadd.f32 %v333_v54, %v305_v53 }
 0x13d   : > { %342 = vmax.xlane.f32.xlu1 %v334_v55 }
 0x19a   : > { %v337_v56 = vpop.xlane.xlu2 %336 }
 0x19b   : > { %v344_v57 = vsub.f32 %v325_v43, %v337_v56 }
 0x19d   : > { %v348_v58 = vmul.f32 1.442695, %v344_v57 }
 0x19f   : > { %608 = vpow2.f32 %v348_v58 }
 0x1a2   : > { %v339_v59 = vpop.xlane.xlu2 %338 }
 0x1a3   : > { %v345_v60 = vsub.f32 %v328_v47, %v339_v59 }
 0x1a5   : > { %v609_v61 = vpop.eup %608  ;;  %v350_v62 = vmul.f32 1.442695, %v345_v60 }
 0x1a6   : > { %356 = vadd.xlane.f32.xlu2 %v609_v61 }
 0x1a7   : > { %610 = vpow2.f32 %v350_v62 }
 0x1a8   : > { %v341_v63 = vpop.xlane.xlu0 %340 }
 0x1a9   : > { %v346_v0 = vsub.f32 %v331_v51, %v341_v63 }
 0x1ab   : > { %v352_v1 = vmul.f32 1.442695, %v346_v0 }
 0x1ad   : > { %v611_v2 = vpop.eup %610  ;;  %612 = vpow2.f32 %v352_v1 }
 0x1ae   : > { %358 = vadd.xlane.f32.xlu2 %v611_v2 }
 0x1b0   : > { %v343_v3 = vpop.xlane.xlu1 %342 }
 0x1b1   : > { %v347_v4 = vsub.f32 %v334_v55, %v343_v3 }
 0x1b3   : > { %v354_v5 = vmul.f32 1.442695, %v347_v4  ;;  %v613_v6 = vpop.eup %612 }
 0x1b5   : > { %614 = vpow2.f32 %v354_v5 }
 0x1b6   : > { %360 = vadd.xlane.f32.xlu2 %v613_v6 }
 0x1bb   : > { %v615_v7 = vpop.eup %614 }
 0x1be   : > { %362 = vadd.xlane.f32.xlu2 %v615_v7 }
 0x219   : > { %v357_v8 = vpop.xlane.xlu2 %356 }
 0x221   : > { %v359_v9 = vpop.xlane.xlu2 %358 }
 0x222   : > { %616 = vlog2.f32 %v359_v9 }
 0x223   : > { %618 = vlog2.f32 %v357_v8 }
 0x228   : > { %v617_v11 = vpop.eup %616 }
 0x229   : > { %v361_v10 = vpop.xlane.xlu2 %360  ;;  %v619_v12 = vpop.eup %618  ;;  %v367_v13 = vmul.f32 0.6931472, %v617_v11 }
 0x22a   : > { %620 = vlog2.f32 %v361_v10  ;;  %v365_v15 = vmul.f32 0.6931472, %v619_v12 }
 0x22b   : > { %v373_v18 = vadd.f32 %v367_v13, %v339_v59 }
 0x22c   : > { %v372_v19 = vadd.f32 %v365_v15, %v337_v56 }
 0x22d   : > { %v378_v21 = vsel %vm376_vm3, %v373_v18, 0.0 }
 0x22e   : > { %v377_v23 = vsel %vm376_vm3, %v372_v19, 0.0 }
 0x22f   : > { %v379_v26 = vadd.f32 %v378_v21, %v377_v23 }
 0x230   : > { %v621_v14 = vpop.eup %620 }
 0x231   : > { %v369_v16 = vmul.f32 0.6931472, %v621_v14  ;;  %v363_v17 = vpop.xlane.xlu2 %362 }
 0x232   : > { %622 = vlog2.f32 %v363_v17 }
 0x233   : > { %v374_v20 = vadd.f32 %v369_v16, %v341_v63 }
 0x235   : > { %v380_v25 = vsel %vm376_vm3, %v374_v20, 0.0 }
 0x236   : > { %v381_v28 = vadd.f32 %v380_v25, %v379_v26 }
 0x238   : > { %v623_v22 = vpop.eup %622 }
 0x239   : > { %v371_v24 = vmul.f32 0.6931472, %v623_v22 }
 0x23b   : > { %v375_v27 = vadd.f32 %v371_v24, %v343_v3 }
 0x23d   : > { %v382_v29 = vsel %vm376_vm3, %v375_v27, 0.0 }
 0x23e   : > { %v383_v30 = vadd.f32 %v382_v29, %v381_v28 }
 0x240   : > { %384 = vadd.xlane.f32.xlu2 %v383_v30 }
 0x2b3   : > { %v385_v31 = vpop.xlane.xlu2 %384 }
 0x2b4   : > { %v386_v32 = vrot.slane %v385_v31, 4 }
 0x2b6   : > { %v387_v33 = vadd.f32 %v386_v32, %v385_v31 }
 0x2b8   : > { %v388_v34 = vrot.slane %v387_v33, 2 }
 0x2ba   : > { %v389_v35 = vadd.f32 %v388_v34, %v387_v33 }
 0x2bc   : > { %v390_v36 = vrot.slane %v389_v35, 1 }
 0x2be   : > { %v391_v37 = vadd.f32 %v390_v36, %v389_v35 }
 0x2c0   : > { %545 = vpush %v391_v37 }
 0x2f1   : > { %s546_s8 = spop %545 }
 0x2f2   : > { %v393_v38 = vstv %s546_s8 }
 0x2f3   : > { %395 = vst [vmem:[%s207_s29] sm:$0xff] %v393_v38 }
 0x2f4   : > { %711 = shalt.err (!%p708_p10)
}
 0x2f5   : > { %553 = dma.vmem_to_hbm [thread:$0]  (%p849_p3), %s410_s30, 128, %s412_s7, %s397_s9  }
 0x2f6 PF: > { %s423_s6 = sand.u32 1, %s742_s12   ;;  %p961_p12 = scmp.ge.s32.totalorder %s754_s15, 2 }
 0x2f7   : > { %s424_s27 = scalar_lea.sflag [#allocation4], %s423_s6 }
 0x2f8   : > { %p564_p13 = pnand %p961_p12, %p815_p6 }
 0x2fa   : > { %p565_p0 = pneg %p564_p13 }
 0x2fc   : > { %737 = dma.done.wait (%p565_p0), %s424_s27, 128  }
 0x2fd   : > { %739 = vsyncadd (%p565_p0), %s424_s27, 4294967168  ;;  %p17_p5 = scmp.ge.s32.totalorder %s833_s26, 4   ;;  %s962_s12 = smov %s746_s13 }
 0x2fe   : > { %s963_s13 = smov %s750_s14  ;;  %s964_s14 = smov %s845_s4 }
 0x2ff   : > { %s965_s15 = smov %s833_s26  ;;  %19 = sbr.rel (!%p17_p5) target bundleno = 6 (0x6), region = 81 }
 0x304   :  { %430 = vsyncpa [#allocation3], 1 }
 0x305   :  { %432 = vsyncpa [#allocation3 + $0x1], 1 }
 0x306   :  { %433 = vsyncpa [#allocation6], 1 }
 0x307   :  { %434 = vsyncpa [#allocation4], 1 }
 0x308   :  { %436 = vsyncpa [#allocation4 + $0x1], 1 }

</bundles_post_ra>
